<compile_context>
chip_gen: v7x
topology: tpu7x:2x2x1
jax: 0.10.0
libtpu: 0.0.40
codegen_flags: <defaults>
</compile_context>

<pallas_src>
import jax
import jax.numpy as jnp
from jax.experimental import pallas as pl
from jax.experimental.pallas import tpu as pltpu


def _round_up(x, m):
    return ((x + m - 1) // m) * m


def _embed_matmul_kernel(patch_ref, w_ref, pos_ref, out_ref, acc_ref):
    # patch_ref: (tm, tk)  streamed row/K tile of flattened patches
    # w_ref:     (tk, tn)  projection-weight tile
    # pos_ref:   (tm, tn)  (position embedding + bias) tile, k-invariant (resident)
    # out_ref:   (tm, tn)
    # acc_ref:   (tm, tn)  f32 accumulator scratch
    k = pl.program_id(2)

    @pl.when(k == 0)
    def _():
        acc_ref[...] = jnp.zeros_like(acc_ref)

    acc_ref[...] += jnp.dot(patch_ref[...], w_ref[...],
                            preferred_element_type=jnp.float32)

    @pl.when(k == pl.num_programs(2) - 1)
    def _():
        out_ref[...] = (acc_ref[...] +
                        pos_ref[...].astype(jnp.float32)).astype(out_ref.dtype)


def embeddings_forward(x, weight, bias, pos_emb, patch_size, *, compute_dtype=None):
    """x: (B, C, D, H, W). weight: (E, C, p, p, p). bias: (E,). pos_emb: (1, N, E).

    Returns (B, N, E) with N = (D/p)*(H/p)*(W/p).  compute_dtype=jnp.bfloat16
    optionally runs the MXU in bf16 (f32 accumulation) on v6e/v7x.
    """
    B, C, D, H, W = x.shape
    E = weight.shape[0]
    p = patch_size
    nd, nh, nw = D // p, H // p, W // p
    N = nd * nh * nw
    K = C * p * p * p
    M = B * N

    # --- glue: extract non-overlapping 3D patches -> (M, K) ------------------
    # TODO(synk): fold this gather into the kernel (grid over (b, nd), block
    # (1, C, p, H, W)) to avoid the extra HBM round trip; matters most on v5e/v6e.
    xp = x.reshape(B, C, nd, p, nh, p, nw, p)
    xp = xp.transpose(0, 2, 4, 6, 1, 3, 5, 7)
    patches = xp.reshape(M, K)

    # Conv weight (E, C, p, p, p) -> dense projection (K, E).
    w_mat = weight.reshape(E, K).T
    # Fold the conv bias into the position embedding: one input stream less.
    posb = pos_emb.reshape(N, E) + bias.reshape(1, E)

    # --- tiling: lane-dense K/E (multiples of 128), row tiles on M = B*N -----
    tm = _round_up(M, 8) if M <= 512 else 512
    Kp = _round_up(K, 128)
    tk = min(512, Kp)
    Kp = _round_up(Kp, tk)
    Ep = _round_up(E, 128)
    tn = min(256, Ep)
    Ep = _round_up(Ep, tn)
    Mp = _round_up(M, tm)

    # Zero padding keeps results exact; padded rows/cols are sliced off below.
    patches = jnp.pad(patches, ((0, Mp - M), (0, Kp - K)))
    w_mat = jnp.pad(w_mat, ((0, Kp - K), (0, Ep - E)))
    posb = jnp.pad(posb, ((0, 0), (0, Ep - E)))
    # The position embedding is periodic along the flattened M axis: tile it.
    posb = jnp.broadcast_to(posb[None], (B, N, Ep)).reshape(M, Ep)
    posb = jnp.pad(posb, ((0, Mp - M), (0, 0)))

    if compute_dtype is not None:
        patches = patches.astype(compute_dtype)
        w_mat = w_mat.astype(compute_dtype)

    gm, gn, gk = Mp // tm, Ep // tn, Kp // tk

    itemsize = jnp.dtype(patches.dtype).itemsize
    vmem_bytes = (2 * tm * tk * itemsize        # patches tile (double-buffered)
                  + 2 * tk * tn * itemsize      # weight tile
                  + 2 * tm * tn * 4             # pos+bias tile
                  + tm * tn * 4                 # f32 accumulator
                  + 2 * tm * tn * jnp.dtype(x.dtype).itemsize)  # output tile
    # Explicit limit: comfortably within v7x's 64 MiB physical VMEM as well.
    vmem_limit = int(min(max(2 * vmem_bytes, 16 * 1024 * 1024), 32 * 1024 * 1024))

    out_padded = pl.pallas_call(
        _embed_matmul_kernel,
        out_shape=jax.ShapeDtypeStruct((Mp, Ep), x.dtype),
        grid_spec=pltpu.PrefetchScalarGridSpec(
            num_scalar_prefetch=0,
            grid=(gm, gn, gk),
            in_specs=[
                pl.BlockSpec((tm, tk), lambda i, j, k: (i, k)),   # patches (streamed over K)
                pl.BlockSpec((tk, tn), lambda i, j, k: (k, j)),   # projection weight
                pl.BlockSpec((tm, tn), lambda i, j, k: (i, j)),   # pos + bias (k-invariant)
            ],
            out_specs=pl.BlockSpec((tm, tn), lambda i, j, k: (i, j)),
            scratch_shapes=[pltpu.VMEM((tm, tn), jnp.float32)],
        ),
        compiler_params=pltpu.CompilerParams(
            dimension_semantics=("parallel", "parallel", "arbitrary"),
            vmem_limit_bytes=vmem_limit,
        ),
    )(patches, w_mat, posb)

    # Dropout with p=0.0 is the identity.
    return out_padded[:M, :E].reshape(B, N, E)


if __name__ == "__main__":
    # Small shapes consistent with the module: input_shape = (B, C, D, H, W).
    B, C, D, H, W = 2, 4, 8, 8, 8
    patch_size = 4
    embed_dim = 32
    n_patches = (D * H * W) // (patch_size ** 3)  # 8

    key = jax.random.PRNGKey(0)
    kx, kw, kb, kp = jax.random.split(key, 4)

    x = jax.random.normal(kx, (B, C, D, H, W), dtype=jnp.float32)
    weight = 0.02 * jax.random.normal(
        kw, (embed_dim, C, patch_size, patch_size, patch_size), dtype=jnp.float32)
    bias = 0.01 * jax.random.normal(kb, (embed_dim,), dtype=jnp.float32)
    # The module initializes position embeddings to zeros; use small random values
    # so the addition path is actually exercised.
    pos_emb = 0.02 * jax.random.normal(kp, (1, n_patches, embed_dim), dtype=jnp.float32)

    out = embeddings_forward(x, weight, bias, pos_emb, patch_size)
    out = jax.block_until_ready(out)

    # Reference check in plain JAX (same patch-as-matmul formulation).
    nd, nh, nw = D // patch_size, H // patch_size, W // patch_size
    K = C * patch_size ** 3
    xp = x.reshape(B, C, nd, patch_size, nh, patch_size, nw, patch_size)
    xp = xp.transpose(0, 2, 4, 6, 1, 3, 5, 7).reshape(B, n_patches, K)
    ref = (jnp.einsum("bnk,ke->bne", xp, weight.reshape(embed_dim, K).T)
           + bias[None, None, :] + pos_emb)

    assert out.shape == (B, n_patches, embed_dim)
    assert jnp.allclose(out, ref, atol=1e-5, rtol=1e-5)

    print("KERNEL_OK")
</pallas_src>

<mosaic_0001>
module attributes {stable_mosaic.version = 11 : i64} {
  func.func @_embed_matmul_kernel(%arg0: i32, %arg1: i32, %arg2: i32, %arg3: memref<16x256xf32, #tpu.memory_space<vmem>>, %arg4: memref<256x128xf32, #tpu.memory_space<vmem>>, %arg5: memref<16x128xf32, #tpu.memory_space<vmem>>, %arg6: memref<16x128xf32, #tpu.memory_space<vmem>>, %arg7: memref<16x128xf32, #tpu.memory_space<vmem>>) attributes {dimension_semantics = [#tpu.dimension_semantics<parallel>, #tpu.dimension_semantics<parallel>, #tpu.dimension_semantics<arbitrary>], iteration_bounds = array<i64: 1, 1, 1>, scalar_prefetch = 0 : i64, scratch_operands = 1 : i64, tpu.core_type = #tpu.core_type<tc>, window_params = [{transform_indices = @transform_0, window_bounds = array<i64: 16, 256>}, {transform_indices = @transform_1, window_bounds = array<i64: 256, 128>}, {transform_indices = @transform_2, window_bounds = array<i64: 16, 128>}, {transform_indices = @transform_3, window_bounds = array<i64: 16, 128>}]} {
    %c0_i32 = arith.constant 0 : i32
    %0 = arith.cmpi eq, %arg2, %c0_i32 : i32
    %1 = arith.extui %0 : i1 to i32
    %c0_i32_0 = arith.constant 0 : i32
    %2 = arith.cmpi ne, %1, %c0_i32_0 : i32
    scf.if %2 {
      %cst_10 = arith.constant 0.000000e+00 : f32
      %12 = vector.broadcast %cst_10 : f32 to vector<16x128xf32>
      %c0_11 = arith.constant 0 : index
      %c0_12 = arith.constant 0 : index
      %13 = vector.load %arg7[%c0_11, %c0_12] : memref<16x128xf32, #tpu.memory_space<vmem>>, vector<16x128xf32>
      tpu.vector_store %arg7[%c0_11, %c0_12], %12 {strides = array<i32>} : memref<16x128xf32, #tpu.memory_space<vmem>>, vector<16x128xf32>,
    } else {
    }
    %c0 = arith.constant 0 : index
    %c0_1 = arith.constant 0 : index
    %3 = vector.load %arg7[%c0, %c0_1] : memref<16x128xf32, #tpu.memory_space<vmem>>, vector<16x128xf32>
    %c0_2 = arith.constant 0 : index
    %c0_3 = arith.constant 0 : index
    %4 = vector.load %arg3[%c0_2, %c0_3] : memref<16x256xf32, #tpu.memory_space<vmem>>, vector<16x256xf32>
    %c0_4 = arith.constant 0 : index
    %c0_5 = arith.constant 0 : index
    %5 = vector.load %arg4[%c0_4, %c0_5] : memref<256x128xf32, #tpu.memory_space<vmem>>, vector<256x128xf32>
    %cst = arith.constant dense<0.000000e+00> : vector<16x128xf32>
    %6 = tpu.matmul %4, %5, %cst {dimension_numbers = #tpu.dot_dimension_numbers<[1], [0], [0], [1], [0, 0, 1, 1], [], []>} : vector<16x256xf32>, vector<256x128xf32>, vector<16x128xf32> -> vector<16x128xf32>
    %7 = arith.addf %3, %6 : vector<16x128xf32>
    %c0_6 = arith.constant 0 : index
    %c0_7 = arith.constant 0 : index
    %8 = vector.load %arg7[%c0_6, %c0_7] : memref<16x128xf32, #tpu.memory_space<vmem>>, vector<16x128xf32>
    tpu.vector_store %arg7[%c0_6, %c0_7], %7 {strides = array<i32>} : memref<16x128xf32, #tpu.memory_space<vmem>>, vector<16x128xf32>,
    %c0_i32_8 = arith.constant 0 : i32
    %9 = arith.cmpi eq, %arg2, %c0_i32_8 : i32
    %10 = arith.extui %9 : i1 to i32
    %c0_i32_9 = arith.constant 0 : i32
    %11 = arith.cmpi ne, %10, %c0_i32_9 : i32
    scf.if %11 {
      %c0_10 = arith.constant 0 : index
      %c0_11 = arith.constant 0 : index
      %12 = vector.load %arg7[%c0_10, %c0_11] : memref<16x128xf32, #tpu.memory_space<vmem>>, vector<16x128xf32>
      %c0_12 = arith.constant 0 : index
      %c0_13 = arith.constant 0 : index
      %13 = vector.load %arg5[%c0_12, %c0_13] : memref<16x128xf32, #tpu.memory_space<vmem>>, vector<16x128xf32>
      %14 = arith.addf %12, %13 : vector<16x128xf32>
      %c0_14 = arith.constant 0 : index
      %c0_15 = arith.constant 0 : index
      %15 = vector.load %arg6[%c0_14, %c0_15] : memref<16x128xf32, #tpu.memory_space<vmem>>, vector<16x128xf32>
      tpu.vector_store %arg6[%c0_14, %c0_15], %14 {strides = array<i32>} : memref<16x128xf32, #tpu.memory_space<vmem>>, vector<16x128xf32>,
    } else {
    }
    return
  }
  func.func @transform_0(%arg0: i32, %arg1: i32, %arg2: i32) -> (i32, i32) {
    %c0_i32 = arith.constant 0 : i32
    return %arg0, %arg2 : i32, i32
  }
  func.func @transform_1(%arg0: i32, %arg1: i32, %arg2: i32) -> (i32, i32) {
    %c0_i32 = arith.constant 0 : i32
    return %arg2, %arg1 : i32, i32
  }
  func.func @transform_2(%arg0: i32, %arg1: i32, %arg2: i32) -> (i32, i32) {
    %c0_i32 = arith.constant 0 : i32
    return %arg0, %arg1 : i32, i32
  }
  func.func @transform_3(%arg0: i32, %arg1: i32, %arg2: i32) -> (i32, i32) {
    %c0_i32 = arith.constant 0 : i32
    return %arg0, %arg1 : i32, i32
  }
}

</mosaic_0001>

<bundles_post_ra>
// kernel: tpu_custom_call.1
= control target key start
LH: loop header
LB: loop body
LE: loop exit
PB: predicated region body
PF: predicated region fallthrough
CT: control target
= control target key end

     0   :  { %8 = vsyncpa [#allocation4], 0  ;;  %s481_s0 = inlined_call_operand.hbm [shape: f32[16,256], index: 0, kind: input, shape index: {}]   ;;  %s482_s1 = inlined_call_operand.hbm [shape: f32[256,128], index: 1, kind: input, shape index: {}]   ;;  %s483_s2 = inlined_call_operand.hbm [shape: f32[16,128], index: 2, kind: input, shape index: {}]   ;;  %s484_s3 = inlined_call_operand.hbm [shape: f32[16,128], index: 3, kind: output, shape index: {}]  }
   0x1   :  { %9 = vsyncpa [#allocation7], 0 }
   0x2   :  { %10 = vsyncpa [#allocation5], 0  ;;  %s396_s12 = smov [#allocation6]   ;;  %s302_s16 = scalar_lea.hbm %s482_s1, 4096 }
   0x3   :  { %s28_s13 = sshll.u32 %s396_s12, 4  ;;  %p303_p0 = scmp.ne.s32.totalorder %s482_s1, %s302_s16  ;;  %s29_s13 = int_to_ptr.vmem [resolvable:$true] %s28_s13 }
   0x4   :  { %p306_p1 = scmp.lt.u32.totalorder %s302_s16, %s482_s1 }
   0x6   :  { %p308_p2 = pnand %p306_p1, %p303_p0 }
   0x8   :  { %311 = shalt.err (!%p308_p2)
}
   0x9   :  { %s312_s21 = scalar_lea.vmem %s29_s13, 4096  ;;  %p317_p4 = scmp.lt.s32.totalorder %s29_s13, %s29_s13 }
   0xa   :  { %p313_p3 = scmp.ne.s32.totalorder %s29_s13, %s312_s21  ;;  %p318_p5 = scmp.lt.s32.totalorder %s312_s21, %s312_s21 }
   0xc   :  { %p319_p6 = por %p318_p5, %p317_p4 }
   0xe   :  { %p320_p7 = pnand %p319_p6, %p313_p3 }
  0x10   :  { %323 = shalt.err (!%p320_p7)
}
  0x11   :  { %s397_s22 = smov 128   ;;  %s398_s23 = smov 8  }
  0x12   :  { %34 = dma.hbm_to_vmem [thread:$0]  %s482_s1, 4096, %s29_s13, [#allocation7], %s397_s22, %s397_s22, %s398_s23  }
  0x13   :  { %s399_s26 = smov [#allocation3]   ;;  %s324_s30 = scalar_lea.hbm %s481_s0, 512 }
  0x14   :  { %s16_s27 = sshll.u32 %s399_s26, 4  ;;  %p325_p8 = scmp.ne.s32.totalorder %s481_s0, %s324_s30  ;;  %s17_s27 = int_to_ptr.vmem [resolvable:$true] %s16_s27 }
  0x15   :  { %p328_p9 = scmp.lt.u32.totalorder %s324_s30, %s481_s0 }
  0x17   :  { %p330_p10 = pnand %p328_p9, %p325_p8 }
  0x19   :  { %333 = shalt.err (!%p330_p10)
}
  0x1a   :  { %s334_s8 = scalar_lea.vmem %s17_s27, 512  ;;  %p339_p12 = scmp.lt.s32.totalorder %s17_s27, %s17_s27 }
  0x1b   :  { %p335_p11 = scmp.ne.s32.totalorder %s17_s27, %s334_s8  ;;  %p340_p13 = scmp.lt.s32.totalorder %s334_s8, %s334_s8 }
  0x1d   :  { %p341_p0 = por %p340_p13, %p339_p12 }
  0x1f   :  { %p342_p1 = pnand %p341_p0, %p335_p11 }
  0x21   :  { %345 = shalt.err (!%p342_p1)
}
  0x22   :  { %s400_s1 = smov 256   ;;  %s401_s9 = smov 16  }
  0x23   :  { %22 = dma.hbm_to_vmem [thread:$0]  %s481_s0, 512, %s17_s27, [#allocation4], %s400_s1, %s400_s1, %s401_s9  }
  0x24   :  { %s402_s12 = smov [#allocation8]   ;;  %s346_s16 = scalar_lea.hbm %s483_s2, 256 }
  0x25   :  { %s40_s13 = sshll.u32 %s402_s12, 4  ;;  %p347_p2 = scmp.ne.s32.totalorder %s483_s2, %s346_s16  ;;  %s41_s13 = int_to_ptr.vmem [resolvable:$true] %s40_s13 }
  0x26   :  { %p350_p3 = scmp.lt.u32.totalorder %s346_s16, %s483_s2 }
  0x28   :  { %p352_p4 = pnand %p350_p3, %p347_p2 }
  0x2a   :  { %355 = shalt.err (!%p352_p4)
}
  0x2b   :  { %s356_s21 = scalar_lea.vmem %s41_s13, 256  ;;  %p361_p6 = scmp.lt.s32.totalorder %s41_s13, %s41_s13 }
  0x2c   :  { %p357_p5 = scmp.ne.s32.totalorder %s41_s13, %s356_s21  ;;  %p362_p7 = scmp.lt.s32.totalorder %s356_s21, %s356_s21 }
  0x2e   :  { %p363_p8 = por %p362_p7, %p361_p6 }
  0x30   :  { %p364_p9 = pnand %p363_p8, %p357_p5 }
  0x32   :  { %367 = shalt.err (!%p364_p9)
}
  0x33   :  { %46 = dma.hbm_to_vmem [thread:$0]  %s483_s2, 256, %s41_s13, [#allocation7], %s397_s22, %s397_s22, %s398_s23  }
  0x34   :  { %390 = dma.done.wait [#allocation4], 512  }
  0x35   :  { %391 = vsyncadd [#allocation4], 4294966784 }
  0x36   :  { %392 = dma.done.wait [#allocation7], 4352  }
  0x37   :  { %393 = vsyncadd [#allocation7], 4294962944  ;;  %v84_v0 = vld [vmem:[#allocation6 + $0x80] sm:$0xff]  ;;  %v85_v1 = vld [vmem:[#allocation6 + $0x88] sm:$0xff]  ;;  %s403_s2 = smov [#allocation9]  }
  0x38   :  { %v68_v2 = vld [vmem:[#allocation6] sm:$0xff]  ;;  %v246_v3 = vpack.c.bf16 %v85_v1, %v84_v0  ;;  %v69_v4 = vld [vmem:[#allocation6 + $0x8] sm:$0xff]  ;;  %v86_v5 = vld [vmem:[#allocation6 + $0x90] sm:$0xff]  ;;  %s195_s25 = sshll.u32 %s403_s2, 4  ;;  %s196_s25 = int_to_ptr.vmem [resolvable:$true] %s195_s25 }
  0x39   :  { %v87_v6 = vld [vmem:[#allocation6 + $0x98] sm:$0xff]  ;;  %v248_v7 = vpack.c.bf16 %v69_v4, %v68_v2  ;;  %v70_v9 = vld [vmem:[#allocation6 + $0x10] sm:$0xff]  ;;  %v88_v11 = vld [vmem:[#allocation6 + $0xa0] sm:$0xff]  ;;  %s368_s26 = scalar_lea.vmem %s196_s25, 256  ;;  %p373_p11 = scmp.lt.s32.totalorder %s196_s25, %s196_s25 }
  0x3a   :  { %v250_v8 = vpack.c.bf16 %v87_v6, %v86_v5  ;;  %v71_v10 = vld [vmem:[#allocation6 + $0x18] sm:$0xff]  ;;  %247 = vmatprep.subr.bf16.mxu0 %v246_v3  ;;  %278 = vmatprep.subr.bf16.mxu1 %v246_v3  ;;  %v89_v12 = vld [vmem:[#allocation6 + $0xa8] sm:$0xff]  ;;  %v72_v15 = vld [vmem:[#allocation6 + $0x20] sm:$0xff]  ;;  %p369_p10 = scmp.ne.s32.totalorder %s196_s25, %s368_s26  ;;  %p374_p12 = scmp.lt.s32.totalorder %s368_s26, %s368_s26 }
  0x3b   :  { %249 = vmatpush3.bf16.msra.mxu0 %v248_v7  ;;  %286 = vmatpush3.bf16.msra.mxu1 %v248_v7  ;;  %v252_v13 = vpack.c.bf16 %v71_v10, %v70_v9  ;;  %v254_v14 = vpack.c.bf16 %v89_v12, %v88_v11  ;;  %v73_v16 = vld [vmem:[#allocation6 + $0x28] sm:$0xff]  ;;  %v90_v17 = vld [vmem:[#allocation6 + $0xb0] sm:$0xff]  ;;  %v91_v18 = vld [vmem:[#allocation6 + $0xb8] sm:$0xff] }
  0x3c   :  { %251 = vmatprep.subr.bf16.mxu0 %v250_v8  ;;  %279 = vmatprep.subr.bf16.mxu1 %v250_v8  ;;  %v256_v19 = vpack.c.bf16 %v73_v16, %v72_v15  ;;  %v258_v20 = vpack.c.bf16 %v91_v18, %v90_v17  ;;  %v74_v21 = vld [vmem:[#allocation6 + $0x30] sm:$0xff]  ;;  %v75_v22 = vld [vmem:[#allocation6 + $0x38] sm:$0xff]  ;;  %v92_v23 = vld [vmem:[#allocation6 + $0xc0] sm:$0xff]  ;;  %p375_p13 = por %p374_p12, %p373_p11 }
  0x3d   :  { %v93_v24 = vld [vmem:[#allocation6 + $0xc8] sm:$0xff]  ;;  %v67_v26 = vld [vmem:[#allocation3 + $0x18] sm:$0xff]  ;;  %v260_v27 = vpack.c.bf16 %v75_v22, %v74_v21  ;;  %v76_v29 = vld [vmem:[#allocation6 + $0x40] sm:$0xff] }
  0x3e   :  { %v65_v25 = vld [vmem:[#allocation3 + $0x8] sm:$0xff]  ;;  %v262_v28 = vpack.c.bf16 %v93_v24, %v92_v23  ;;  %v94_v31 = vld [vmem:[#allocation6 + $0xd0] sm:$0xff]  ;;  %v95_v32 = vld [vmem:[#allocation6 + $0xd8] sm:$0xff]  ;;  %169 = vmatprep.mubr.f32.mxu1 %v67_v26  ;;  %p376_p0 = pnand %p375_p13, %p369_p10 }
  0x3f   :  { %253 = vmatpush3.bf16.msra.mxu0 %v252_v13  ;;  %287 = vmatpush3.bf16.msra.mxu1 %v252_v13  ;;  %v77_v30 = vld [vmem:[#allocation6 + $0x48] sm:$0xff]  ;;  %v266_v34 = vpack.c.bf16 %v95_v32, %v94_v31  ;;  %v78_v35 = vld [vmem:[#allocation6 + $0x50] sm:$0xff]  ;;  %v79_v36 = vld [vmem:[#allocation6 + $0x58] sm:$0xff] }
  0x40   :  { %255 = vmatprep.subr.bf16.mxu0 %v254_v14  ;;  %280 = vmatprep.subr.bf16.mxu1 %v254_v14  ;;  %v264_v33 = vpack.c.bf16 %v77_v30, %v76_v29  ;;  %v96_v37 = vld [vmem:[#allocation6 + $0xe0] sm:$0xff]  ;;  %v97_v38 = vld [vmem:[#allocation6 + $0xe8] sm:$0xff]  ;;  %v268_v39 = vpack.c.bf16 %v79_v36, %v78_v35  ;;  %v98_v43 = vld [vmem:[#allocation6 + $0xf0] sm:$0xff] }
  0x41   :  { %164 = vmatprep.mubr.f32.mxu0 %v65_v25  ;;  %v270_v40 = vpack.c.bf16 %v97_v38, %v96_v37  ;;  %v80_v41 = vld [vmem:[#allocation6 + $0x60] sm:$0xff]  ;;  %v81_v42 = vld [vmem:[#allocation6 + $0x68] sm:$0xff]  ;;  %v99_v44 = vld [vmem:[#allocation6 + $0xf8] sm:$0xff] }
  0x42   :  { %v272_v45 = vpack.c.bf16 %v81_v42, %v80_v41  ;;  %v274_v46 = vpack.c.bf16 %v99_v44, %v98_v43  ;;  %v82_v47 = vld [vmem:[#allocation6 + $0x70] sm:$0xff]  ;;  %v83_v48 = vld [vmem:[#allocation6 + $0x78] sm:$0xff]  ;;  %v64_v50 = vld [vmem:[#allocation3] sm:$0xff] }
  0x43   :  { %257 = vmatpush3.bf16.msra.mxu0 %v256_v19  ;;  %288 = vmatpush3.bf16.msra.mxu1 %v256_v19  ;;  %v276_v49 = vpack.c.bf16 %v83_v48, %v82_v47  ;;  %v66_v51 = vld [vmem:[#allocation3 + $0x10] sm:$0xff]  ;;  %v184_v55 = vld [vmem:[#allocation8] sm:$0xff]  ;;  %v185_v57 = vld [vmem:[#allocation8 + $0x8] sm:$0xff] }
  0x44   :  { %259 = vmatprep.subr.bf16.mxu0 %v258_v20  ;;  %281 = vmatprep.subr.bf16.mxu1 %v258_v20 }
  0x47   :  { %261 = vmatpush3.bf16.msra.mxu0 %v260_v27  ;;  %289 = vmatpush3.bf16.msra.mxu1 %v260_v27 }
  0x48   :  { %263 = vmatprep.subr.bf16.mxu0 %v262_v28  ;;  %282 = vmatprep.subr.bf16.mxu1 %v262_v28 }
  0x4b   :  { %265 = vmatpush3.bf16.msra.mxu0 %v264_v33  ;;  %290 = vmatpush3.bf16.msra.mxu1 %v264_v33 }
  0x4c   :  { %267 = vmatprep.subr.bf16.mxu0 %v266_v34  ;;  %283 = vmatprep.subr.bf16.mxu1 %v266_v34 }
  0x4f   :  { %269 = vmatpush3.bf16.msra.mxu0 %v268_v39  ;;  %291 = vmatpush3.bf16.msra.mxu1 %v268_v39 }
  0x50   :  { %271 = vmatprep.subr.bf16.mxu0 %v270_v40  ;;  %284 = vmatprep.subr.bf16.mxu1 %v270_v40 }
  0x53   :  { %273 = vmatpush3.bf16.msra.mxu0 %v272_v45  ;;  %292 = vmatpush3.bf16.msra.mxu1 %v272_v45 }
  0x54   :  { %275 = vmatprep.subr.bf16.mxu0 %v274_v46  ;;  %285 = vmatprep.subr.bf16.mxu1 %v274_v46 }
  0x57   :  { %277 = vmatpush3.bf16.msra.mxu0 %v276_v49  ;;  %293 = vmatpush3.bf16.msra.mxu1 %v276_v49 }
  0x5a   :  { %165 = vmatmul.mubr.f32.vlgmr.msra.gmra.mrb[0].mxu0 %v64_v50  ;;  %170 = vmatmul.mubr.f32.vlgmr.msra.gmra.mrb[0].mxu1 %v66_v51 }
 0x12d   :  { %v240_v52 = vpop.f32.mrb[0].mxu0  ;;  %v243_v53 = vpop.f32.mrb[0].mxu1 }
 0x12e   :  { %v241_v54 = vpop.f32.mrb[1].mxu0  ;;  %v244_v56 = vpop.f32.mrb[1].mxu1 }
 0x12f   :  { %v242_v58 = vadd.f32 %v241_v54, %v240_v52  ;;  %v245_v59 = vadd.f32 %v244_v56, %v243_v53 }
 0x131   :  { %v186_v60 = vadd.f32 %v242_v58, %v184_v55  ;;  %v187_v61 = vadd.f32 %v245_v59, %v185_v57 }
 0x133   :  { %188 = vst [vmem:[#allocation9] sm:$0xff] %v186_v60  ;;  %189 = vst [vmem:[#allocation9 + $0x8] sm:$0xff] %v187_v61 }
 0x134   :  { %379 = shalt.err (!%p376_p0)
}
 0x135   :  { %s380_s29 = scalar_lea.hbm %s484_s3, 256 }
 0x136   :  { %p381_p1 = scmp.ne.s32.totalorder %s484_s3, %s380_s29  ;;  %p384_p2 = scmp.lt.u32.totalorder %s380_s29, %s484_s3 }
 0x138   :  { %p386_p3 = pnand %p384_p2, %p381_p1 }
 0x13a   :  { %389 = shalt.err (!%p386_p3)
}
 0x13b   :  { %201 = dma.vmem_to_hbm [thread:$0]  %s196_s25, 256, %s484_s3, [#allocation5], %s397_s22, %s397_s22, %s398_s23  }
 0x13c   :  { %394 = dma.done.wait [#allocation5], 256  }
 0x13d   :  { %395 = vsyncadd [#allocation5], 4294967040 }
 0x13e   :  { %205 = vsyncpa [#allocation4], 1 }
 0x13f   :  { %206 = vsyncpa [#allocation7], 1 }
 0x140   :  { %207 = vsyncpa [#allocation5], 1 }

</bundles_post_ra>
